<compile_context>
chip_gen: v7x
topology: tpu7x:2x2x1
jax: 0.10.0
libtpu: 0.0.40
codegen_flags: <defaults>
</compile_context>

<pallas_src>
import jax
import jax.numpy as jnp
from jax.experimental import pallas as pl
from jax.experimental.pallas import tpu as pltpu
import numpy as np


def _round_up(n, m):
    return ((n + m - 1) // m) * m


def _trend_block_kernel(x_ref, w1_ref, w234_ref, b_ref, wbf_ref, out_ref):
    b = b_ref[...]                       # (4, U) biases, loaded once per tile

    # fc1 .. fc4, ReLU after each (MXU matmul + VPU max)
    h = jnp.dot(x_ref[...], w1_ref[...], preferred_element_type=jnp.float32)
    h = jnp.maximum(h + b[0:1, :], 0.0)
    h = jnp.dot(h, w234_ref[0], preferred_element_type=jnp.float32)
    h = jnp.maximum(h + b[1:2, :], 0.0)
    h = jnp.dot(h, w234_ref[1], preferred_element_type=jnp.float32)
    h = jnp.maximum(h + b[2:3, :], 0.0)
    h = jnp.dot(h, w234_ref[2], preferred_element_type=jnp.float32)
    h = jnp.maximum(h + b[3:4, :], 0.0)

    # fused (shared theta projection) @ ([T_back | T_fore]) -> one lane-dense slab
    out_ref[...] = jnp.dot(h, wbf_ref[...], preferred_element_type=jnp.float32)


def trend_block_forward(x, packed_params, backcast_length, forecast_length):
    """Pallas TrendBlock forward.  x: (B, backcast_length) or (B, backcast_length, 1)."""
    # squeeze_last_dim (glue, plain JAX)
    if x.ndim == 3 and x.shape[-1] == 1:
        x = x[..., 0]
    B = x.shape[0]

    w1, w234, b, wbf = packed_params
    L_total = backcast_length + forecast_length

    # Batch tiling: TM rows per grid step (8-aligned; capped at 128 so a tile
    # fills an MXU pass without extra vreg pressure — also the right choice on
    # v5e's 4x128^2 MXU).  Pad batch to a multiple of TM and slice afterwards.
    TM = min(128, _round_up(max(B, 1), 8))
    B_pad = _round_up(B, TM)
    if B_pad != B:
        x = jnp.pad(x, ((0, B_pad - B), (0, 0)))
    grid = (B_pad // TM,)

    out = pl.pallas_call(
        _trend_block_kernel,
        out_shape=jax.ShapeDtypeStruct((B_pad, L_total), jnp.float32),
        grid_spec=pltpu.PrefetchScalarGridSpec(
            num_scalar_prefetch=0,
            grid=grid,
            in_specs=[
                # batch-tiled input (double-buffered by the pipeline)
                pl.BlockSpec((TM, backcast_length), lambda i: (i, 0)),
                # weights: constant index maps -> stay resident in VMEM
                pl.BlockSpec(w1.shape, lambda i: (0, 0)),
                pl.BlockSpec(w234.shape, lambda i: (0, 0, 0)),
                pl.BlockSpec(b.shape, lambda i: (0, 0)),
                pl.BlockSpec(wbf.shape, lambda i: (0, 0)),
            ],
            out_specs=pl.BlockSpec((TM, L_total), lambda i: (i, 0)),
        ),
        compiler_params=pltpu.CompilerParams(
            dimension_semantics=("parallel",),   # batch shards across TCs on v7x
        ),
    )(x, w1, w234, b, wbf)

    backcast = out[:B, :backcast_length]
    forecast = out[:B, backcast_length:]
    return backcast, forecast


def make_params(key, units, thetas_dim, backcast_length, forecast_length):
    """Deterministic synthetic parameters (un-fused, mirrors the torch module).
    Weights are (in, out); biases (1, out)."""
    ks = jax.random.split(key, 9)
    scale = 0.1

    def w(k, shape):
        return (scale * jax.random.normal(k, shape)).astype(jnp.float32)

    w1 = w(ks[0], (backcast_length, units))
    b1 = w(ks[1], (1, units))
    w2 = w(ks[2], (units, units))
    b2 = w(ks[3], (1, units))
    w3 = w(ks[4], (units, units))
    b3 = w(ks[5], (1, units))
    w4 = w(ks[6], (units, units))
    b4 = w(ks[7], (1, units))
    wt = w(ks[8], (units, thetas_dim))  # shared theta_b_fc / theta_f_fc (no bias)

    # trend basis matrices: T[i, :] = t**i, t = arange(H)/H
    t_b = np.arange(0, backcast_length) / backcast_length
    t_f = np.arange(0, forecast_length) / forecast_length
    T_back = jnp.asarray(np.stack([t_b ** i for i in range(thetas_dim)]), dtype=jnp.float32)
    T_fore = jnp.asarray(np.stack([t_f ** i for i in range(thetas_dim)]), dtype=jnp.float32)

    return (w1, b1, w2, b2, w3, b3, w4, b4, wt, T_back, T_fore)


def pack_params(params):
    """Host-side packing / algebraic folding for the kernel:
       - w2,w3,w4 stacked as (3, U, U)
       - b1..b4 stacked as (4, U)
       - Wbf = wt @ [T_back | T_fore]   (thetas projection folded into basis)"""
    (w1, b1, w2, b2, w3, b3, w4, b4, wt, T_back, T_fore) = params
    w234 = jnp.stack([w2, w3, w4], axis=0)                     # (3, U, U)
    b = jnp.concatenate([b1, b2, b3, b4], axis=0)              # (4, U)
    wbf = wt @ jnp.concatenate([T_back, T_fore], axis=1)       # (U, Lb + Lf)
    return (w1, w234, b, wbf)


def reference_forward(x, params, backcast_length, forecast_length):
    """Pure-JAX reference mirroring the PyTorch module semantics."""
    if x.ndim == 3 and x.shape[-1] == 1:
        x = x[..., 0]
    (w1, b1, w2, b2, w3, b3, w4, b4, wt, T_back, T_fore) = params
    h = jax.nn.relu(x @ w1 + b1)
    h = jax.nn.relu(h @ w2 + b2)
    h = jax.nn.relu(h @ w3 + b3)
    h = jax.nn.relu(h @ w4 + b4)
    thetas = h @ wt
    return thetas @ T_back, thetas @ T_fore


if __name__ == "__main__":
    batch = 8
    units = 32
    thetas_dim = 4            # p <= 4 (asserted in trend_model)
    backcast_length = 10
    forecast_length = 5

    key = jax.random.PRNGKey(0)
    k_x, k_p = jax.random.split(key)

    # input mimics a (batch, backcast_length, 1) series -> squeeze_last_dim applies
    x = jax.random.normal(k_x, (batch, backcast_length, 1), dtype=jnp.float32)
    params = make_params(k_p, units, thetas_dim, backcast_length, forecast_length)
    packed = pack_params(params)

    backcast, forecast = trend_block_forward(x, packed, backcast_length, forecast_length)
    backcast = jax.block_until_ready(backcast)
    forecast = jax.block_until_ready(forecast)

    # correctness check against pure-JAX reference (un-fused math)
    ref_back, ref_fore = reference_forward(x, params, backcast_length, forecast_length)
    assert backcast.shape == (batch, backcast_length)
    assert forecast.shape == (batch, forecast_length)
    np.testing.assert_allclose(np.asarray(backcast), np.asarray(ref_back), rtol=1e-4, atol=1e-5)
    np.testing.assert_allclose(np.asarray(forecast), np.asarray(ref_fore), rtol=1e-4, atol=1e-5)

    print("KERNEL_OK")
</pallas_src>

<mosaic_0001>
module attributes {stable_mosaic.version = 11 : i64} {
  func.func @_trend_block_kernel(%arg0: i32, %arg1: memref<8x10xf32, #tpu.memory_space<vmem>>, %arg2: memref<10x32xf32, #tpu.memory_space<vmem>>, %arg3: memref<3x32x32xf32, #tpu.memory_space<vmem>>, %arg4: memref<4x32xf32, #tpu.memory_space<vmem>>, %arg5: memref<32x15xf32, #tpu.memory_space<vmem>>, %arg6: memref<8x15xf32, #tpu.memory_space<vmem>>) attributes {dimension_semantics = [#tpu.dimension_semantics<parallel>], iteration_bounds = array<i64: 1>, scalar_prefetch = 0 : i64, scratch_operands = 0 : i64, tpu.core_type = #tpu.core_type<tc>, window_params = [{transform_indices = @transform_0, window_bounds = array<i64: 8, 10>}, {pipeline_mode = #tpu.pipeline_mode<synchronous>, transform_indices = @transform_1, window_bounds = array<i64: 10, 32>}, {pipeline_mode = #tpu.pipeline_mode<synchronous>, transform_indices = @transform_2, window_bounds = array<i64: 3, 32, 32>}, {pipeline_mode = #tpu.pipeline_mode<synchronous>, transform_indices = @transform_3, window_bounds = array<i64: 4, 32>}, {pipeline_mode = #tpu.pipeline_mode<synchronous>, transform_indices = @transform_4, window_bounds = array<i64: 32, 15>}, {transform_indices = @transform_5, window_bounds = array<i64: 8, 15>}]} {
    %c0 = arith.constant 0 : index
    %c0_0 = arith.constant 0 : index
    %0 = vector.load %arg4[%c0, %c0_0] : memref<4x32xf32, #tpu.memory_space<vmem>>, vector<4x32xf32>
    %c0_1 = arith.constant 0 : index
    %c0_2 = arith.constant 0 : index
    %1 = vector.load %arg1[%c0_1, %c0_2] : memref<8x10xf32, #tpu.memory_space<vmem>>, vector<8x10xf32>
    %c0_3 = arith.constant 0 : index
    %c0_4 = arith.constant 0 : index
    %2 = vector.load %arg2[%c0_3, %c0_4] : memref<10x32xf32, #tpu.memory_space<vmem>>, vector<10x32xf32>
    %cst = arith.constant dense<0.000000e+00> : vector<8x32xf32>
    %3 = tpu.matmul %1, %2, %cst {dimension_numbers = #tpu.dot_dimension_numbers<[1], [0], [0], [1], [0, 0, 1, 1], [], []>} : vector<8x10xf32>, vector<10x32xf32>, vector<8x32xf32> -> vector<8x32xf32>
    %4 = vector.extract_strided_slice %0 {offsets = [0, 0], sizes = [1, 32], strides = [1, 1]} : vector<4x32xf32> to vector<1x32xf32>
    %5 = vector.broadcast %4 : vector<1x32xf32> to vector<8x32xf32>
    %6 = arith.addf %3, %5 : vector<8x32xf32>
    %cst_5 = arith.constant 0.000000e+00 : f32
    %7 = vector.broadcast %cst_5 : f32 to vector<8x32xf32>
    %8 = arith.maximumf %6, %7 : vector<8x32xf32>
    %c0_6 = arith.constant 0 : index
    %c0_7 = arith.constant 0 : index
    %c0_8 = arith.constant 0 : index
    %9 = vector.load %arg3[%c0_6, %c0_7, %c0_8] : memref<3x32x32xf32, #tpu.memory_space<vmem>>, vector<1x32x32xf32>
    %10 = vector.shape_cast %9 : vector<1x32x32xf32> to vector<32x32xf32>
    %cst_9 = arith.constant dense<0.000000e+00> : vector<8x32xf32>
    %11 = tpu.matmul %8, %10, %cst_9 {dimension_numbers = #tpu.dot_dimension_numbers<[1], [0], [0], [1], [0, 0, 1, 1], [], []>} : vector<8x32xf32>, vector<32x32xf32>, vector<8x32xf32> -> vector<8x32xf32>
    %12 = vector.extract_strided_slice %0 {offsets = [1, 0], sizes = [1, 32], strides = [1, 1]} : vector<4x32xf32> to vector<1x32xf32>
    %13 = vector.broadcast %12 : vector<1x32xf32> to vector<8x32xf32>
    %14 = arith.addf %11, %13 : vector<8x32xf32>
    %cst_10 = arith.constant 0.000000e+00 : f32
    %15 = vector.broadcast %cst_10 : f32 to vector<8x32xf32>
    %16 = arith.maximumf %14, %15 : vector<8x32xf32>
    %c1 = arith.constant 1 : index
    %c0_11 = arith.constant 0 : index
    %c0_12 = arith.constant 0 : index
    %17 = vector.load %arg3[%c1, %c0_11, %c0_12] : memref<3x32x32xf32, #tpu.memory_space<vmem>>, vector<1x32x32xf32>
    %18 = vector.shape_cast %17 : vector<1x32x32xf32> to vector<32x32xf32>
    %cst_13 = arith.constant dense<0.000000e+00> : vector<8x32xf32>
    %19 = tpu.matmul %16, %18, %cst_13 {dimension_numbers = #tpu.dot_dimension_numbers<[1], [0], [0], [1], [0, 0, 1, 1], [], []>} : vector<8x32xf32>, vector<32x32xf32>, vector<8x32xf32> -> vector<8x32xf32>
    %20 = vector.extract_strided_slice %0 {offsets = [2, 0], sizes = [1, 32], strides = [1, 1]} : vector<4x32xf32> to vector<1x32xf32>
    %21 = vector.broadcast %20 : vector<1x32xf32> to vector<8x32xf32>
    %22 = arith.addf %19, %21 : vector<8x32xf32>
    %cst_14 = arith.constant 0.000000e+00 : f32
    %23 = vector.broadcast %cst_14 : f32 to vector<8x32xf32>
    %24 = arith.maximumf %22, %23 : vector<8x32xf32>
    %c2 = arith.constant 2 : index
    %c0_15 = arith.constant 0 : index
    %c0_16 = arith.constant 0 : index
    %25 = vector.load %arg3[%c2, %c0_15, %c0_16] : memref<3x32x32xf32, #tpu.memory_space<vmem>>, vector<1x32x32xf32>
    %26 = vector.shape_cast %25 : vector<1x32x32xf32> to vector<32x32xf32>
    %cst_17 = arith.constant dense<0.000000e+00> : vector<8x32xf32>
    %27 = tpu.matmul %24, %26, %cst_17 {dimension_numbers = #tpu.dot_dimension_numbers<[1], [0], [0], [1], [0, 0, 1, 1], [], []>} : vector<8x32xf32>, vector<32x32xf32>, vector<8x32xf32> -> vector<8x32xf32>
    %28 = vector.extract_strided_slice %0 {offsets = [3, 0], sizes = [1, 32], strides = [1, 1]} : vector<4x32xf32> to vector<1x32xf32>
    %29 = vector.broadcast %28 : vector<1x32xf32> to vector<8x32xf32>
    %30 = arith.addf %27, %29 : vector<8x32xf32>
    %cst_18 = arith.constant 0.000000e+00 : f32
    %31 = vector.broadcast %cst_18 : f32 to vector<8x32xf32>
    %32 = arith.maximumf %30, %31 : vector<8x32xf32>
    %c0_19 = arith.constant 0 : index
    %c0_20 = arith.constant 0 : index
    %33 = vector.load %arg5[%c0_19, %c0_20] : memref<32x15xf32, #tpu.memory_space<vmem>>, vector<32x15xf32>
    %cst_21 = arith.constant dense<0.000000e+00> : vector<8x15xf32>
    %34 = tpu.matmul %32, %33, %cst_21 {dimension_numbers = #tpu.dot_dimension_numbers<[1], [0], [0], [1], [0, 0, 1, 1], [], []>} : vector<8x32xf32>, vector<32x15xf32>, vector<8x15xf32> -> vector<8x15xf32>
    %c0_22 = arith.constant 0 : index
    %c0_23 = arith.constant 0 : index
    %35 = vector.load %arg6[%c0_22, %c0_23] : memref<8x15xf32, #tpu.memory_space<vmem>>, vector<8x15xf32>
    tpu.vector_store %arg6[%c0_22, %c0_23], %34 {strides = array<i32>} : memref<8x15xf32, #tpu.memory_space<vmem>>, vector<8x15xf32>,
    return
  }
  func.func @transform_0(%arg0: i32) -> (i32, i32) {
    %c0_i32 = arith.constant 0 : i32
    %c0_i32_0 = arith.constant 0 : i32
    return %arg0, %c0_i32 : i32, i32
  }
  func.func @transform_1(%arg0: i32) -> (i32, i32) {
    %c0_i32 = arith.constant 0 : i32
    %c0_i32_0 = arith.constant 0 : i32
    %c0_i32_1 = arith.constant 0 : i32
    return %c0_i32, %c0_i32_0 : i32, i32
  }
  func.func @transform_2(%arg0: i32) -> (i32, i32, i32) {
    %c0_i32 = arith.constant 0 : i32
    %c0_i32_0 = arith.constant 0 : i32
    %c0_i32_1 = arith.constant 0 : i32
    %c0_i32_2 = arith.constant 0 : i32
    return %c0_i32, %c0_i32_0, %c0_i32_1 : i32, i32, i32
  }
  func.func @transform_3(%arg0: i32) -> (i32, i32) {
    %c0_i32 = arith.constant 0 : i32
    %c0_i32_0 = arith.constant 0 : i32
    %c0_i32_1 = arith.constant 0 : i32
    return %c0_i32, %c0_i32_0 : i32, i32
  }
  func.func @transform_4(%arg0: i32) -> (i32, i32) {
    %c0_i32 = arith.constant 0 : i32
    %c0_i32_0 = arith.constant 0 : i32
    %c0_i32_1 = arith.constant 0 : i32
    return %c0_i32, %c0_i32_0 : i32, i32
  }
  func.func @transform_5(%arg0: i32) -> (i32, i32) {
    %c0_i32 = arith.constant 0 : i32
    %c0_i32_0 = arith.constant 0 : i32
    return %arg0, %c0_i32 : i32, i32
  }
}

</mosaic_0001>

<bundles_post_ra>
// kernel: tpu_custom_call.1
= control target key start
LH: loop header
LB: loop body
LE: loop exit
PB: predicated region body
PF: predicated region fallthrough
CT: control target
= control target key end

     0   :  { %10 = vsyncpa [#allocation3], 0  ;;  %s733_s0 = inlined_call_operand.vmem [shape: f32[8,10], index: 0, kind: input, shape index: {}]   ;;  %s734_s1 = inlined_call_operand.vmem [shape: f32[10,32], index: 1, kind: input, shape index: {}]   ;;  %s735_s2 = inlined_call_operand.hbm [shape: f32[3,32,32], index: 2, kind: input, shape index: {}]   ;;  %s736_s3 = inlined_call_operand.vmem [shape: f32[4,32], index: 3, kind: input, shape index: {}]   ;;  %s737_s4 = inlined_call_operand.vmem [shape: f32[32,15], index: 4, kind: input, shape index: {}]   ;;  %s738_s5 = inlined_call_operand.hbm [shape: f32[8,15], index: 5, kind: output, shape index: {}]  }
   0x1   :  { %11 = vsyncpa [#allocation4], 0  ;;  %s629_s18 = smov [#allocation2]   ;;  %s581_s22 = scalar_lea.hbm %s735_s2, 1536 }
   0x2   :  { %s21_s19 = sshll.u32 %s629_s18, 4  ;;  %p582_p0 = scmp.ne.s32.totalorder %s735_s2, %s581_s22  ;;  %s22_s19 = int_to_ptr.vmem [resolvable:$true] %s21_s19 }
   0x3   :  { %p585_p1 = scmp.lt.u32.totalorder %s581_s22, %s735_s2 }
   0x5   :  { %p587_p2 = pnand %p585_p1, %p582_p0 }
   0x7   :  { %590 = shalt.err (!%p587_p2)
}
   0x8   :  { %s591_s27 = scalar_lea.vmem %s22_s19, 1536  ;;  %p596_p4 = scmp.lt.s32.totalorder %s22_s19, %s22_s19 }
   0x9   :  { %p592_p3 = scmp.ne.s32.totalorder %s22_s19, %s591_s27  ;;  %p597_p5 = scmp.lt.s32.totalorder %s591_s27, %s591_s27 }
   0xb   :  { %p598_p6 = por %p597_p5, %p596_p4 }
   0xd   :  { %p599_p7 = pnand %p598_p6, %p592_p3 }
   0xf   :  { %602 = shalt.err (!%p599_p7)
}
  0x10   :  { %s630_s28 = smov 128   ;;  %s631_s29 = smov 8  }
  0x11   :  { %27 = dma.hbm_to_vmem [thread:$0]  %s735_s2, 1536, %s22_s19, [#allocation3], %s630_s28, %s630_s28, %s631_s29  }
  0x12   :  { %625 = dma.done.wait [#allocation3], 1536  }
  0x13   :  { %626 = vsyncadd [#allocation3], 4294965760  ;;  %v632_v0 = vmov 0.0|0.0   ;;  %vm633_vm0 = vmmov 0   ;;  %v634_v1 = vmov 0.0   ;;  %vm47_vm1 = vcmask 1041408  }
  0x14   :  { %545 = vmatprep.subr.bf16.mxu0 %v632_v0  ;;  %549 = vmatprep.subr.bf16.mxu1 %v632_v0  ;;  %v37_v2 = vld [vmem:[%s734_s1] sm:$0xff]  ;;  %v38_v3 = vld [vmem:[%s734_s1 + $0x8] sm:$0x3]  ;;  %vm635_vm2 = vmmov 1   ;;  %vm43_vm4 = vcmask 80896   ;;  %v124_v9 = vld [vmem:[#allocation2 + $0x10] sm:$0xff]  ;;  %v39_v15 = vlaneseq }
  0x15   :  { %498 = vmatprep.mubr.msk.f32.mxu0 %vm633_vm0, %v634_v1  ;;  %509 = vmatprep.mubr.msk.f32.mxu1 %vm633_vm0, %v634_v1  ;;  %vm547_vm3 = vmpackc.low %vm47_vm1, %vm635_vm2  ;;  %v546_v4 = vpack.c.bf16 %v38_v3, %v37_v2  ;;  %v122_v5 = vld [vmem:[#allocation2] sm:$0xff]  ;;  %v123_v6 = vld [vmem:[#allocation2 + $0x8] sm:$0xff]  ;;  %vm130_vm5 = vcmask 261120   ;;  %s636_s19 = smov [#allocation5]   ;;  %vm448_vm6 = vcmask 121856  }
  0x16   :  { %v550_v7 = vpack.c.bf16 %v123_v6, %v122_v5  ;;  %v36_v8 = vld [vmem:[%s733_s0] sm:$0xff]  ;;  %v125_v10 = vld [vmem:[#allocation2 + $0x18] sm:$0xff]  ;;  %v207_v13 = vld [vmem:[#allocation2 + $0x28] sm:$0xff]  ;;  %v40_v16 = vshrl.u32 %v39_v15, 7  ;;  %s456_s20 = sshll.u32 %s636_s19, 4  ;;  %s457_s20 = int_to_ptr.vmem [resolvable:$true] %s456_s20 }
  0x17   :  { %548 = vmatpush3.bf16.msk.msra.mxu0 %vm547_vm3, %v546_v4  ;;  %v553_v11 = vpack.c.bf16 %v125_v10, %v124_v9  ;;  %v206_v12 = vld [vmem:[#allocation2 + $0x20] sm:$0xff]  ;;  %v208_v24 = vld [vmem:[#allocation2 + $0x30] sm:$0xff]  ;;  %v209_v25 = vld [vmem:[#allocation2 + $0x38] sm:$0xff]  ;;  %s603_s21 = scalar_lea.vmem %s457_s20, 128  ;;  %p608_p9 = scmp.lt.s32.totalorder %s457_s20, %s457_s20 }
  0x18   :  { %551 = vmatpush3.bf16.msra.mxu1 %v550_v7  ;;  %555 = vmatprep.subr.bf16.mxu0 %v632_v0  ;;  %v556_v14 = vpack.c.bf16 %v207_v13, %v206_v12  ;;  %v41_v17 = vsub.s32 0, %v40_v16  ;;  %v35_v18 = vld [vmem:[%s736_s3] sm:$0xf]  ;;  %v559_v26 = vpack.c.bf16 %v209_v25, %v208_v24  ;;  %v290_v28 = vld [vmem:[#allocation2 + $0x48] sm:$0xff]  ;;  %v128_v30 = vsub.s32 1, %v40_v16  ;;  %v291_v36 = vld [vmem:[#allocation2 + $0x50] sm:$0xff]  ;;  %p604_p8 = scmp.ne.s32.totalorder %s457_s20, %s603_s21  ;;  %p609_p10 = scmp.lt.s32.totalorder %s603_s21, %s603_s21 }
  0x19   :  { %552 = vmatprep.subr.bf16.mxu1 %v632_v0  ;;  %v289_v27 = vld [vmem:[#allocation2 + $0x40] sm:$0xff]  ;;  %v292_v37 = vld [vmem:[#allocation2 + $0x58] sm:$0xff]  ;;  %v372_v40 = vld [vmem:[%s737_s4 + $0x8] sm:$0xff]  ;;  %v212_v42 = vsub.s32 2, %v40_v16  ;;  %v295_v51 = vsub.s32 3, %v40_v16 }
  0x1a   :  { %499 = vmatmul.mubr.msk.f32.vlgmr.msra.gmra.mrb[0].mxu0 %vm43_vm4, %v36_v8  ;;  %v42_v19 = vrot.slane %v35_v18, %v41_v17  ;;  %v562_v29 = vpack.c.bf16 %v290_v28, %v289_v27  ;;  %v129_v31 = vrot.slane %v35_v18, %v128_v30  ;;  %v565_v38 = vpack.c.bf16 %v292_v37, %v291_v36  ;;  %v371_v39 = vld [vmem:[%s737_s4] sm:$0xff]  ;;  %v373_v48 = vld [vmem:[%s737_s4 + $0x10] sm:$0xff]  ;;  %v374_v49 = vld [vmem:[%s737_s4 + $0x18] sm:$0xff]  ;;  %p610_p11 = por %p609_p10, %p608_p9 }
  0x1b   :  { %520 = vmatprep.mubr.msk.f32.mxu0 %vm633_vm0, %v634_v1  ;;  %557 = vmatpush3.bf16.msra.mxu0 %v556_v14  ;;  %v568_v41 = vpack.c.bf16 %v372_v40, %v371_v39  ;;  %v213_v43 = vrot.slane %v35_v18, %v212_v42  ;;  %v571_v50 = vpack.c.bf16 %v374_v49, %v373_v48 }
  0x1c   :  { %554 = vmatpush3.bf16.msra.mxu1 %v553_v11  ;;  %558 = vmatprep.subr.bf16.mxu0 %v632_v0  ;;  %v296_v52 = vrot.slane %v35_v18, %v295_v51  ;;  %p611_p12 = pnand %p610_p11, %p604_p8 }
  0x1d   :  { %561 = vmatprep.subr.bf16.mxu1 %v632_v0 }
  0x1f   :  { %560 = vmatpush3.bf16.msra.mxu0 %v559_v26 }
  0x20   :  { %567 = vmatprep.subr.bf16.mxu0 %v632_v0 }
  0xed   :  { %v117_v20 = vpop.f32.mrb[0].mxu0 }
  0xee   :  { %v118_v21 = vadd.f32 %v117_v20, %v42_v19  ;;  %v500_v22 = vpop.f32.mrb[1].mxu0 }
  0xf0   :  { %v121_v23 = vmax.f32 %v118_v21, 0.0 }
  0xf2   :  { %510 = vmatmul.mubr.msk.f32.vlgmr.msra.gmra.mrb[0].mxu1 %vm130_vm5, %v121_v23 }
  0xf3   :  { %531 = vmatprep.mubr.msk.f32.mxu1 %vm633_vm0, %v634_v1  ;;  %563 = vmatpush3.bf16.msra.mxu1 %v562_v29 }
  0xf4   :  { %564 = vmatprep.subr.bf16.mxu1 %v632_v0 }
  0xf7   :  { %566 = vmatpush3.bf16.msra.mxu1 %v565_v38 }
 0x1c5   :  { %v200_v32 = vpop.f32.mrb[0].mxu1 }
 0x1c6   :  { %v201_v33 = vadd.f32 %v200_v32, %v129_v31  ;;  %v511_v34 = vpop.f32.mrb[1].mxu1 }
 0x1c8   :  { %v204_v35 = vmax.f32 %v201_v33, 0.0 }
 0x1ca   :  { %521 = vmatmul.mubr.msk.f32.vlgmr.msra.gmra.mrb[2].mxu0 %vm130_vm5, %v204_v35 }
 0x1cb   :  { %542 = vmatprep.mubr.msk.f32.mxu0 %vm633_vm0, %v634_v1  ;;  %569 = vmatpush3.bf16.msra.mxu0 %v568_v41 }
 0x1cc   :  { %570 = vmatprep.subr.bf16.mxu0 %v632_v0 }
 0x1cf   :  { %572 = vmatpush3.bf16.msra.mxu0 %v571_v50 }
 0x29d   :  { %v283_v44 = vpop.f32.mrb[2].mxu0 }
 0x29e   :  { %v284_v45 = vadd.f32 %v283_v44, %v213_v43  ;;  %v522_v46 = vpop.f32.mrb[3].mxu0 }
 0x2a0   :  { %v287_v47 = vmax.f32 %v284_v45, 0.0 }
 0x2a2   :  { %532 = vmatmul.mubr.msk.f32.vlgmr.msra.gmra.mrb[2].mxu1 %vm130_vm5, %v287_v47 }
 0x375   :  { %v366_v53 = vpop.f32.mrb[2].mxu1 }
 0x376   :  { %v367_v54 = vadd.f32 %v366_v53, %v296_v52  ;;  %v533_v55 = vpop.f32.mrb[3].mxu1 }
 0x378   :  { %v370_v56 = vmax.f32 %v367_v54, 0.0 }
 0x37a   :  { %543 = vmatmul.mubr.msk.f32.vlgmr.msra.gmra.mrb[4].mxu0 %vm130_vm5, %v370_v56 }
 0x44d   :  { %v444_v57 = vpop.f32.mrb[4].mxu0 }
 0x44e   :  { %v544_v58 = vpop.f32.mrb[5].mxu0  ;;  %449 = vst.msk [vmem:[#allocation5] sm:$0xff] %vm448_vm6, %v444_v57 }
 0x44f   :  { %614 = shalt.err (!%p611_p12)
}
 0x450   :  { %s615_s23 = scalar_lea.hbm %s738_s5, 128 }
 0x451   :  { %p616_p13 = scmp.ne.s32.totalorder %s738_s5, %s615_s23  ;;  %p619_p0 = scmp.lt.u32.totalorder %s615_s23, %s738_s5 }
 0x453   :  { %p621_p1 = pnand %p619_p0, %p616_p13 }
 0x455   :  { %624 = shalt.err (!%p621_p1)
}
 0x456   :  { %459 = dma.vmem_to_hbm [thread:$0]  %s457_s20, 128, %s738_s5, [#allocation4]  }
 0x457   :  { %627 = dma.done.wait [#allocation4], 128  }
 0x458   :  { %628 = vsyncadd [#allocation4], 4294967168 }
 0x459   :  { %463 = vsyncpa [#allocation3], 1 }
 0x45a   :  { %464 = vsyncpa [#allocation4], 1 }

</bundles_post_ra>
